<compile_context>
chip_gen: v5e
topology: v5e:2x2
jax: 0.10.0
libtpu: 0.0.40
codegen_flags: <defaults>
</compile_context>

<pallas_src>
import functools

import jax
import jax.numpy as jnp
import numpy as np
from jax.experimental import pallas as pl
from jax.experimental.pallas import tpu as pltpu

LANE = 128


# ------------------------------- helpers ----------------------------------- #

def _round_up(x, m):
    return (x + m - 1) // m * m


def _pad_axis(a, size, axis):
    if a.shape[axis] == size:
        return a
    pads = [(0, 0)] * a.ndim
    pads[axis] = (0, size - a.shape[axis])
    return jnp.pad(a, pads)


def _conv_w_to_mat(w):
    """(C_out, C_in, KH, KW) -> (KH*KW*C_in, C_out), rows ordered (tap, c) c-fastest."""
    c_out, c_in, kh, kw = w.shape
    return jnp.transpose(w, (2, 3, 1, 0)).reshape(kh * kw * c_in, c_out)


def _pick_tm(m, *, target=512, minimum=128, min_steps=4):
    """Largest M tile (<= target) that still leaves >= min_steps grid steps when m
    allows it -- keeps both v7x TensorCores fed and the DMA pipeline >1 step deep,
    while big tiles amortize the ~0.35us/step overhead on large inputs."""
    tm = target
    while tm > minimum and pl.cdiv(m, tm) < min_steps:
        tm //= 2
    return tm


def _vmem_limit_bytes():
    """Generation-aware VMEM budget: v5e/v6e have 128 MiB/TC, v7x only 64 MiB."""
    try:
        kind = jax.devices()[0].device_kind.lower()
    except Exception:  # e.g. CPU interpret environments
        kind = ""
    if "v5" in kind or "v6" in kind:
        return 96 * 1024 * 1024
    return 48 * 1024 * 1024


# --------------------- kernel 1: fused offset+modulator -------------------- #

def _fused_conv_kernel(a_ref, w_ref, b_ref, o_ref, *, mod_start, mod_end):
    """out = A @ W + bias, with 2*sigmoid fused on the modulator columns.

    K = KK*C_in is a single step, so there is no accumulator scratch and no
    pl.when (the previous version's program_id-inside-when was also what broke
    interpret-mode lowering)."""
    acc = jnp.dot(a_ref[...], w_ref[...], preferred_element_type=jnp.float32)
    acc = acc + b_ref[...]
    col = jax.lax.broadcasted_iota(jnp.int32, acc.shape, 1)
    is_mod = (col >= mod_start) & (col < mod_end)
    o_ref[...] = jnp.where(is_mod, 2.0 * jax.nn.sigmoid(acc), acc).astype(o_ref.dtype)


def fused_offset_modulator_conv(patches, w_fused, b_fused, mod_start, mod_end,
                                *, tm):
    m_pad, k_dim = patches.shape
    _, n_pad = w_fused.shape
    assert m_pad % tm == 0 and n_pad % LANE == 0

    cost = pl.CostEstimate(
        flops=2 * m_pad * k_dim * n_pad,
        transcendentals=m_pad * n_pad,
        bytes_accessed=(m_pad * k_dim * 2 + k_dim * n_pad * 2
                        + n_pad * 4 + m_pad * n_pad * 4))

    # TODO(synk): grid-invariant w/b specs could use pipeline_mode=pl.Buffered(1)
    # to avoid double-buffering constants once VMEM becomes tight at large C.
    return pl.pallas_call(
        functools.partial(_fused_conv_kernel, mod_start=mod_start,
                          mod_end=mod_end),
        out_shape=jax.ShapeDtypeStruct((m_pad, n_pad), jnp.float32),
        grid=(m_pad // tm,),
        in_specs=[
            pl.BlockSpec((tm, k_dim), lambda i: (i, 0)),
            pl.BlockSpec((k_dim, n_pad), lambda i: (0, 0)),
            pl.BlockSpec((1, n_pad), lambda i: (0, 0)),
        ],
        out_specs=pl.BlockSpec((tm, n_pad), lambda i: (i, 0)),
        compiler_params=pltpu.CompilerParams(
            dimension_semantics=("parallel",),
            vmem_limit_bytes=_vmem_limit_bytes()),
        cost_estimate=cost,
    )(patches, w_fused, b_fused)


# ----------------- kernel 2: deformable-conv projection -------------------- #

def _project_kernel(c_ref, w_ref, o_ref):
    """One full-width MXU contraction: (tm, KK*C) @ (KK*C, C_out_pad)."""
    o_ref[...] = jnp.dot(c_ref[...], w_ref[...],
                         preferred_element_type=jnp.float32).astype(o_ref.dtype)


def deform_project(cols, w_reg_2d, *, tm):
    m_pad, kkc = cols.shape
    kkc_w, n_out_pad = w_reg_2d.shape
    assert kkc == kkc_w and m_pad % tm == 0 and n_out_pad % LANE == 0

    cost = pl.CostEstimate(
        flops=2 * m_pad * kkc * n_out_pad,
        transcendentals=0,
        bytes_accessed=(m_pad * kkc * 2 + kkc * n_out_pad * 2
                        + m_pad * n_out_pad * 2))

    return pl.pallas_call(
        _project_kernel,
        out_shape=jax.ShapeDtypeStruct((m_pad, n_out_pad), jnp.bfloat16),
        grid=(m_pad // tm,),
        in_specs=[
            pl.BlockSpec((tm, kkc), lambda i: (i, 0)),
            pl.BlockSpec((kkc, n_out_pad), lambda i: (0, 0)),
        ],
        out_specs=pl.BlockSpec((tm, n_out_pad), lambda i: (i, 0)),
        compiler_params=pltpu.CompilerParams(
            dimension_semantics=("parallel",),
            vmem_limit_bytes=_vmem_limit_bytes()),
        cost_estimate=cost,
    )(cols, w_reg_2d)


# ------------------------------ param setup -------------------------------- #

def init_params(key, in_channels, out_channels, k=3):
    kk = k * k
    # offset / modulator convs are zero-initialized by the PyTorch module.
    w_off = jnp.zeros((2 * kk, in_channels, k, k), jnp.float32)
    b_off = jnp.zeros((2 * kk,), jnp.float32)
    w_mod = jnp.zeros((kk, in_channels, k, k), jnp.float32)
    b_mod = jnp.zeros((kk,), jnp.float32)
    # regular conv (bias=False in the module default): deterministic uniform init.
    fan_in = in_channels * kk
    bound = 1.0 / np.sqrt(fan_in)
    w_reg = jax.random.uniform(
        key, (out_channels, in_channels, k, k), jnp.float32, -bound, bound)
    return dict(w_off=w_off, b_off=b_off, w_mod=w_mod, b_mod=b_mod, w_reg=w_reg)


# ------------------------------ forward pass ------------------------------- #

def deformable_conv2d_forward(x_nchw, params, k=3, stride=1):
    assert stride == 1, "only stride=1 with SAME padding is implemented"
    N, C, H, W = x_nchw.shape
    pad = (k - 1) // 2                       # SAME padding, odd kernel, stride 1
    KK = k * k
    M = N * H * W
    tm = _pick_tm(M)
    M_pad = _round_up(M, tm)

    x = jnp.transpose(x_nchw, (0, 2, 3, 1))  # NHWC, f32

    # --- im2col patches on the regular grid (offset/modulator conv input).
    # TODO(synk): im2col still materialized by XLA; at large C this should move
    # into kernel 1 as shifted slices of a halo'd spatial tile (manual DMA).
    x_pad = jnp.pad(x.astype(jnp.bfloat16),
                    ((0, 0), (pad, pad), (pad, pad), (0, 0)))
    patches = jnp.stack(
        [x_pad[:, kh:kh + H, kw:kw + W, :] for kh in range(k) for kw in range(k)],
        axis=3)                                              # (N, H, W, KK, C)
    patches_mat = _pad_axis(patches.reshape(M, KK * C), M_pad, 0)

    # --- fused [offset | modulator] weight matrix, lane-padded to 128.
    w_off_mat = _conv_w_to_mat(params["w_off"])              # (KK*C, 2*KK)
    w_mod_mat = _conv_w_to_mat(params["w_mod"])              # (KK*C, KK)
    n_pad = _round_up(3 * KK, LANE)
    w_fused = _pad_axis(jnp.concatenate([w_off_mat, w_mod_mat], axis=1),
                        n_pad, 1).astype(jnp.bfloat16)
    b_fused = _pad_axis(
        jnp.concatenate([params["b_off"], params["b_mod"]])[None, :],
        n_pad, 1).astype(jnp.float32)

    om = fused_offset_modulator_conv(
        patches_mat, w_fused, b_fused,
        mod_start=2 * KK, mod_end=3 * KK, tm=tm)             # (M_pad, 128) f32
    offset = om[:M, :2 * KK]
    modulator = om[:M, 2 * KK:3 * KK]                        # already 2*sigmoid

    # --- deformable sampling positions (torchvision: per-tap interleaved (dy, dx)).
    off = offset.reshape(N, H, W, KK, 2)
    dy, dx = off[..., 0], off[..., 1]
    kh_idx = jnp.arange(KK) // k
    kw_idx = jnp.arange(KK) % k
    by = (jnp.arange(H)[:, None] - pad + kh_idx[None, :]).astype(jnp.float32)
    bx = (jnp.arange(W)[:, None] - pad + kw_idx[None, :]).astype(jnp.float32)
    py = by[None, :, None, :] + dy                           # (N, H, W, KK)
    px = bx[None, None, :, :] + dx

    y0f = jnp.floor(py)
    x0f = jnp.floor(px)
    ly = (py - y0f).reshape(M, KK)
    lx = (px - x0f).reshape(M, KK)
    y0 = y0f.astype(jnp.int32)
    x0 = x0f.astype(jnp.int32)
    y1 = y0 + 1
    x1 = x0 + 1

    x_flat = x.reshape(N, H * W, C)                          # f32 for bilinear

    def gather(yi, xi):
        valid = ((yi >= 0) & (yi < H) & (xi >= 0) & (xi < W)).astype(jnp.float32)
        yc = jnp.clip(yi, 0, H - 1)
        xc = jnp.clip(xi, 0, W - 1)
        flat_idx = (yc * W + xc).reshape(N, -1, 1)           # (N, H*W*KK, 1)
        # TODO(synk): per-pixel data-dependent bilinear gather left in XLA; an
        # in-kernel version needs per-element dynamic addressing / manual DMA.
        v = jnp.take_along_axis(x_flat, flat_idx, axis=1)    # (N, H*W*KK, C)
        return v.reshape(M, KK, C), valid.reshape(M, KK)

    v00, val00 = gather(y0, x0)
    v01, val01 = gather(y0, x1)
    v10, val10 = gather(y1, x0)
    v11, val11 = gather(y1, x1)

    # (M, KK) per-tap weights: bilinear weight * validity * modulator.
    wm00 = modulator * (1.0 - ly) * (1.0 - lx) * val00
    wm01 = modulator * (1.0 - ly) * lx * val01
    wm10 = modulator * ly * (1.0 - lx) * val10
    wm11 = modulator * ly * lx * val11

    # Fuse the 4-corner weighted combine in XLA (f32) into ONE columns array;
    # only this single (M, KK*C) bf16 stream reaches HBM / kernel 2.
    cols = (wm00[..., None] * v00 + wm01[..., None] * v01
            + wm10[..., None] * v10 + wm11[..., None] * v11)  # (M, KK, C) f32
    cols = _pad_axis(cols.reshape(M, KK * C).astype(jnp.bfloat16), M_pad, 0)

    # --- regular conv weight -> (KK*C, C_out) padded to 128 output lanes.
    # (module default bias=False, so no bias path in the projection kernel)
    c_out = params["w_reg"].shape[0]
    n_out_pad = _round_up(c_out, LANE)
    w_reg_2d = _pad_axis(_conv_w_to_mat(params["w_reg"]),
                         n_out_pad, 1).astype(jnp.bfloat16)  # (KK*C, 128)

    out = deform_project(cols, w_reg_2d, tm=tm)              # (M_pad, 128) bf16

    out = out[:M, :c_out].reshape(N, H, W, c_out).astype(jnp.float32)
    return jnp.transpose(out, (0, 3, 1, 2))                  # NCHW f32


# ---------------------------------- main ------------------------------------ #

if __name__ == "__main__":
    key = jax.random.PRNGKey(0)
    k_x, k_w = jax.random.split(key)

    N, C_in, H, W = 2, 4, 16, 16
    C_out = 8

    x = jax.random.normal(k_x, (N, C_in, H, W), jnp.float32)
    params = init_params(k_w, C_in, C_out, k=3)

    fwd = jax.jit(functools.partial(deformable_conv2d_forward, k=3, stride=1))
    out = jax.block_until_ready(fwd(x, params))
    assert out.shape == (N, C_out, H, W), out.shape

    # Sanity check: offset/modulator convs are zero-initialized, so the
    # deformable conv degenerates to a regular SAME conv with mask == 1.
    # Compare against the same bf16-rounded operands the MXU path consumes.
    x_bf = x.astype(jnp.bfloat16).astype(jnp.float32)
    w_bf = params["w_reg"].astype(jnp.bfloat16).astype(jnp.float32)
    ref = jax.lax.conv_general_dilated(
        x_bf, w_bf, window_strides=(1, 1), padding="SAME",
        dimension_numbers=("NCHW", "OIHW", "NCHW"))
    np.testing.assert_allclose(np.asarray(out), np.asarray(ref),
                               rtol=1e-2, atol=1e-2)

    print("KERNEL_OK")
</pallas_src>

<mosaic_0001>
module attributes {stable_mosaic.version = 11 : i64} {
  func.func @_fused_conv_kernel(%arg0: i32, %arg1: memref<128x36xbf16, #tpu.memory_space<vmem>>, %arg2: memref<36x128xbf16, #tpu.memory_space<vmem>>, %arg3: memref<1x128xf32, #tpu.memory_space<vmem>>, %arg4: memref<128x128xf32, #tpu.memory_space<vmem>>) attributes {dimension_semantics = [#tpu.dimension_semantics<parallel>], iteration_bounds = array<i64: 4>, scalar_prefetch = 0 : i64, scratch_operands = 0 : i64, tpu.core_type = #tpu.core_type<tc>, window_params = [{transform_indices = @transform_0, window_bounds = array<i64: 128, 36>}, {pipeline_mode = #tpu.pipeline_mode<synchronous>, transform_indices = @transform_1, window_bounds = array<i64: 36, 128>}, {pipeline_mode = #tpu.pipeline_mode<synchronous>, transform_indices = @transform_2, window_bounds = array<i64: 1, 128>}, {transform_indices = @transform_3, window_bounds = array<i64: 128, 128>}]} {
    %c0 = arith.constant 0 : index
    %c0_0 = arith.constant 0 : index
    %0 = vector.load %arg1[%c0, %c0_0] : memref<128x36xbf16, #tpu.memory_space<vmem>>, vector<128x36xbf16>
    %c0_1 = arith.constant 0 : index
    %c0_2 = arith.constant 0 : index
    %1 = vector.load %arg2[%c0_1, %c0_2] : memref<36x128xbf16, #tpu.memory_space<vmem>>, vector<36x128xbf16>
    %cst = arith.constant dense<0.000000e+00> : vector<128x128xf32>
    %2 = tpu.matmul %0, %1, %cst {dimension_numbers = #tpu.dot_dimension_numbers<[1], [0], [0], [1], [0, 0, 1, 1], [], []>} : vector<128x36xbf16>, vector<36x128xbf16>, vector<128x128xf32> -> vector<128x128xf32>
    %c0_3 = arith.constant 0 : index
    %c0_4 = arith.constant 0 : index
    %3 = vector.load %arg3[%c0_3, %c0_4] : memref<1x128xf32, #tpu.memory_space<vmem>>, vector<1x128xf32>
    %4 = vector.broadcast %3 : vector<1x128xf32> to vector<128x128xf32>
    %5 = arith.addf %2, %4 : vector<128x128xf32>
    %6 = tpu.iota {dimensions = array<i32: 1>} : vector<128x128xi32>
    %c18_i32 = arith.constant 18 : i32
    %7 = vector.broadcast %c18_i32 : i32 to vector<128x128xi32>
    %8 = arith.cmpi sge, %6, %7 : vector<128x128xi32>
    %c27_i32 = arith.constant 27 : i32
    %9 = vector.broadcast %c27_i32 : i32 to vector<128x128xi32>
    %10 = arith.cmpi slt, %6, %9 : vector<128x128xi32>
    %11 = arith.andi %8, %10 : vector<128x128xi1>
    %12 = arith.negf %5 : vector<128x128xf32>
    %13 = math.exp %12 : vector<128x128xf32>
    %cst_5 = arith.constant 1.000000e+00 : f32
    %14 = vector.broadcast %cst_5 : f32 to vector<128x128xf32>
    %15 = arith.addf %14, %13 : vector<128x128xf32>
    %16 = arith.divf %14, %15 : vector<128x128xf32>
    %cst_6 = arith.constant 2.000000e+00 : f32
    %17 = vector.broadcast %cst_6 : f32 to vector<128x128xf32>
    %18 = arith.mulf %17, %16 : vector<128x128xf32>
    %19 = arith.select %11, %18, %5 : vector<128x128xi1>, vector<128x128xf32>
    %c0_7 = arith.constant 0 : index
    %c0_8 = arith.constant 0 : index
    %20 = vector.load %arg4[%c0_7, %c0_8] : memref<128x128xf32, #tpu.memory_space<vmem>>, vector<128x128xf32>
    tpu.vector_store %arg4[%c0_7, %c0_8], %19 {strides = array<i32>} : memref<128x128xf32, #tpu.memory_space<vmem>>, vector<128x128xf32>,
    return
  }
  func.func @transform_0(%arg0: i32) -> (i32, i32) {
    %c0_i32 = arith.constant 0 : i32
    %c0_i32_0 = arith.constant 0 : i32
    return %arg0, %c0_i32 : i32, i32
  }
  func.func @transform_1(%arg0: i32) -> (i32, i32) {
    %c0_i32 = arith.constant 0 : i32
    %c0_i32_0 = arith.constant 0 : i32
    %c0_i32_1 = arith.constant 0 : i32
    return %c0_i32, %c0_i32_0 : i32, i32
  }
  func.func @transform_2(%arg0: i32) -> (i32, i32) {
    %c0_i32 = arith.constant 0 : i32
    %c0_i32_0 = arith.constant 0 : i32
    %c0_i32_1 = arith.constant 0 : i32
    return %c0_i32, %c0_i32_0 : i32, i32
  }
  func.func @transform_3(%arg0: i32) -> (i32, i32) {
    %c0_i32 = arith.constant 0 : i32
    %c0_i32_0 = arith.constant 0 : i32
    return %arg0, %c0_i32 : i32, i32
  }
}

module attributes {stable_mosaic.version = 11 : i64} {
  func.func @_project_kernel(%arg0: i32, %arg1: memref<128x36xbf16, #tpu.memory_space<vmem>>, %arg2: memref<36x128xbf16, #tpu.memory_space<vmem>>, %arg3: memref<128x128xbf16, #tpu.memory_space<vmem>>) attributes {dimension_semantics = [#tpu.dimension_semantics<parallel>], iteration_bounds = array<i64: 4>, scalar_prefetch = 0 : i64, scratch_operands = 0 : i64, tpu.core_type = #tpu.core_type<tc>, window_params = [{transform_indices = @transform_0, window_bounds = array<i64: 128, 36>}, {pipeline_mode = #tpu.pipeline_mode<synchronous>, transform_indices = @transform_1, window_bounds = array<i64: 36, 128>}, {transform_indices = @transform_2, window_bounds = array<i64: 128, 128>}]} {
    %c0 = arith.constant 0 : index
    %c0_0 = arith.constant 0 : index
    %0 = vector.load %arg1[%c0, %c0_0] : memref<128x36xbf16, #tpu.memory_space<vmem>>, vector<128x36xbf16>
    %c0_1 = arith.constant 0 : index
    %c0_2 = arith.constant 0 : index
    %1 = vector.load %arg2[%c0_1, %c0_2] : memref<36x128xbf16, #tpu.memory_space<vmem>>, vector<36x128xbf16>
    %cst = arith.constant dense<0.000000e+00> : vector<128x128xf32>
    %2 = tpu.matmul %0, %1, %cst {dimension_numbers = #tpu.dot_dimension_numbers<[1], [0], [0], [1], [0, 0, 1, 1], [], []>} : vector<128x36xbf16>, vector<36x128xbf16>, vector<128x128xf32> -> vector<128x128xf32>
    %3 = arith.truncf %2 : vector<128x128xf32> to vector<128x128xbf16>
    %c0_3 = arith.constant 0 : index
    %c0_4 = arith.constant 0 : index
    %4 = vector.load %arg3[%c0_3, %c0_4] : memref<128x128xbf16, #tpu.memory_space<vmem>>, vector<128x128xbf16>
    tpu.vector_store %arg3[%c0_3, %c0_4], %3 {strides = array<i32>} : memref<128x128xbf16, #tpu.memory_space<vmem>>, vector<128x128xbf16>,
    return
  }
  func.func @transform_0(%arg0: i32) -> (i32, i32) {
    %c0_i32 = arith.constant 0 : i32
    %c0_i32_0 = arith.constant 0 : i32
    return %arg0, %c0_i32 : i32, i32
  }
  func.func @transform_1(%arg0: i32) -> (i32, i32) {
    %c0_i32 = arith.constant 0 : i32
    %c0_i32_0 = arith.constant 0 : i32
    %c0_i32_1 = arith.constant 0 : i32
    return %c0_i32, %c0_i32_0 : i32, i32
  }
  func.func @transform_2(%arg0: i32) -> (i32, i32) {
    %c0_i32 = arith.constant 0 : i32
    %c0_i32_0 = arith.constant 0 : i32
    return %arg0, %c0_i32 : i32, i32
  }
}

</mosaic_0001>

<bundles_post_ra>
// kernel: deformable_conv2d_forward.2
= control target key start
LH: loop header
LB: loop body
LE: loop exit
PB: predicated region body
PF: predicated region fallthrough
CT: control target
= control target key end

     0   :  { %s941_s12 = smov 0   ;;  %s1341_s0 = inlined_call_operand.vmem [shape: bf16[512,36], index: 0, kind: input, shape index: {}]   ;;  %s1342_s1 = inlined_call_operand.vmem [shape: bf16[36,128], index: 1, kind: input, shape index: {}]   ;;  %s1343_s2 = inlined_call_operand.vmem [shape: f32[1,128], index: 2, kind: input, shape index: {}]   ;;  %s1344_s3 = inlined_call_operand.vmem [shape: f32[512,128], index: 3, kind: output, shape index: {}]  }
   0x1 LB: > { %s746_s13 = sadd.s32 4294967295, %s919_s12   ;;  %p750_p0 = scmp.ge.s32.totalorder %s919_s12, 1  ;;  %s919_s12 = sphi %s941_s12, %s13_s12  }
   0x2   : > { %p138_p1 = scmp.lt.s32.totalorder %s919_s12, 5 }
   0x4   : > { %p139_p2 = pnand %p750_p0, %p138_p1 }
   0x5   : > { %s751_s16 = sshll.u32 (!%p139_p2), %s746_s13, 4 }
   0x6   : > { %142 = sbr.rel (%p139_p2) target bundleno = 248 (0xf8), region = 32  ;;  %p163_p3 = scmp.lt.s32.totalorder (!%p139_p2), %s751_s16, 63 }
   0xb   : > { %v195_v0 = vld [vmem:[%s1342_s1 + $0x10] sm:$0x3]  ;;  %vm280_vm0 = vcmask 1041408   ;;  %s1370_s16 = smov (!%p163_p3, %s751_s16), 63  ;;  %v830_v4 = vld [vmem:[%s1342_s1 + $0x8] sm:$0xff]  ;;  %v829_v5 = vld [vmem:[%s1342_s1] sm:$0xff]  ;;  %v333_v32 = vlaneseq }
   0xc   : > { %v249_v1 = vunpack.c.l.b16 %v195_v0  ;;  %s752_s19 = sshll.u32 %s1370_s16, 2  ;;  %vm255_vm1 = vcmask 293888   ;;  %v975_v14 = vld [vmem:[%s1343_s2] ss:$0 sm:$0xff]  ;;  %s754_s27 = sshll.u32 %s1370_s16, 3 }
   0xd   : > { %s166_s24 = scalar_lea.vmem %s1341_s0, %s752_s19  ;;  %v1006_v38 = vand.u32 127, %v333_v32  ;;  %s1095_s30 = scalar_lea.vmem %s1344_s3, %s754_s27 }
   0xe   : > { %v252_v2 = vpack.c.b16 %v249_v1, %v249_v1  ;;  %v821_v6 = vld [vmem:[%s166_s24] sm:$0xff]  ;;  %v823_v7 = vld [vmem:[%s166_s24 + $0x10] sm:$0xff]  ;;  %v822_v10 = vld [vmem:[%s166_s24 + $0x8] sm:$0xff] }
   0xf   : > { %v825_v8 = vld [vmem:[%s166_s24 + $0x20] sm:$0xff]  ;;  %v827_v9 = vld [vmem:[%s166_s24 + $0x30] sm:$0xff]  ;;  %v824_v11 = vld [vmem:[%s166_s24 + $0x18] sm:$0xff]  ;;  %vm335_vm2 = vcmp.ge.s32.totalorder %v1006_v38, 18  ;;  %vm336_vm3 = vcmp.lt.s32.totalorder %v1006_v38, 27 }
  0x10   : > { %v282_v3 = vsel %vm280_vm0, %v252_v2, 0  ;;  %v826_v12 = vld [vmem:[%s166_s24 + $0x28] sm:$0xff]  ;;  %v828_v13 = vld [vmem:[%s166_s24 + $0x38] sm:$0xff]  ;;  %vm1081_vm15 = vmand %vm335_vm2, %vm336_vm3 }
  0x11   : > { %289 = vmatpush.bf16.msra.mxu0 %v282_v3  ;;  %831 = vmatpush.bf16.msra.mxu1 %v282_v3 }
  0x12   : > { %832 = vmatpush.bf16.msra.mxu2 %v282_v3  ;;  %833 = vmatpush.bf16.msra.mxu3 %v282_v3 }
  0x15   : > { %290 = vmatpush.bf16.msra.mxu0 %v830_v4  ;;  %834 = vmatpush.bf16.msra.mxu1 %v830_v4 }
  0x16   : > { %835 = vmatpush.bf16.msra.mxu2 %v830_v4  ;;  %836 = vmatpush.bf16.msra.mxu3 %v830_v4 }
  0x19   : > { %291 = vmatpush.bf16.msra.mxu0 %v829_v5  ;;  %837 = vmatpush.bf16.msra.mxu1 %v829_v5 }
  0x1a   : > { %838 = vmatpush.bf16.msra.mxu2 %v829_v5  ;;  %839 = vmatpush.bf16.msra.mxu3 %v829_v5 }
  0x1c   : > { %795 = vmatmul.msk.bf16.vlgmr.msra.gmra.mxu0 %vm255_vm1, %v821_v6  ;;  %797 = vmatmul.msk.bf16.vlgmr.msra.gmra.mxu1 %vm255_vm1, %v823_v7 }
  0x1d   : > { %799 = vmatmul.msk.bf16.vlgmr.msra.gmra.mxu2 %vm255_vm1, %v825_v8  ;;  %801 = vmatmul.msk.bf16.vlgmr.msra.gmra.mxu3 %vm255_vm1, %v827_v9 }
  0x2c   : > { %796 = vmatmul.msk.bf16.gmra.mxu0 %vm255_vm1, %v822_v10  ;;  %798 = vmatmul.msk.bf16.gmra.mxu1 %vm255_vm1, %v824_v11 }
  0x2d   : > { %800 = vmatmul.msk.bf16.gmra.mxu2 %vm255_vm1, %v826_v12  ;;  %802 = vmatmul.msk.bf16.gmra.mxu3 %vm255_vm1, %v828_v13 }
  0x99   : > { %v293_v15 = vpop.f32.mrf.mxu0  ;;  %v303_v16 = vpop.f32.mrf.mxu1 }
  0x9a   : > { %v978_v17 = vadd.f32 %v975_v14, %v293_v15  ;;  %v981_v18 = vadd.f32 %v975_v14, %v303_v16 }
  0x9c   : > { %v803_v19 = vmul.f32 -1.442695, %v978_v17  ;;  %v807_v20 = vmul.f32 -1.442695, %v981_v18 }
  0x9e   : > { %849 = vpow2.f32 %v803_v19 }
  0x9f   : > { %851 = vpow2.f32 %v807_v20 }
  0xa0   : > { %v313_v21 = vpop.f32.mrf.mxu2  ;;  %v323_v22 = vpop.f32.mrf.mxu3 }
  0xa1   : > { %v986_v23 = vadd.f32 %v975_v14, %v313_v21  ;;  %v989_v24 = vadd.f32 %v975_v14, %v323_v22  ;;  %v295_v25 = vpop.f32.mrf.mxu0  ;;  %v305_v26 = vpop.f32.mrf.mxu1 }
  0xa2   : > { %v992_v27 = vadd.f32 %v975_v14, %v295_v25  ;;  %v995_v28 = vadd.f32 %v975_v14, %v305_v26 }
  0xa3   : > { %v811_v29 = vmul.f32 -1.442695, %v986_v23  ;;  %v815_v30 = vmul.f32 -1.442695, %v989_v24 }
  0xa4   : > { %v850_v31 = vpop.eup %849  ;;  %v804_v35 = vmul.f32 -1.442695, %v992_v27  ;;  %v808_v37 = vmul.f32 -1.442695, %v995_v28 }
  0xa5   : > { %v852_v33 = vpop.eup %851  ;;  %v999_v34 = vadd.f32 1.0, %v850_v31  ;;  %853 = vpow2.f32 %v811_v29 }
  0xa6   : > { %v1002_v36 = vadd.f32 1.0, %v852_v33  ;;  %855 = vpow2.f32 %v815_v30 }
  0xa7   : > { %857 = vrcp.f32 %v999_v34  ;;  %v411_v43 = vand.u32 2147483647, %v999_v34  ;;  %v413_v44 = vand.u32 2147483648, %v999_v34  ;;  %vm407_vm4 = vweird.f32 %v999_v34 }
  0xa8   : > { %859 = vrcp.f32 %v1002_v36  ;;  %v315_v39 = vpop.f32.mrf.mxu2  ;;  %v325_v40 = vpop.f32.mrf.mxu3  ;;  %v471_v46 = vand.u32 2147483647, %v1002_v36  ;;  %v473_v47 = vand.u32 2147483648, %v1002_v36  ;;  %vm467_vm5 = vweird.f32 %v1002_v36 }
  0xa9   : > { %861 = vpow2.f32 %v804_v35  ;;  %v1010_v41 = vadd.f32 %v975_v14, %v315_v39  ;;  %v298_v42 = vpop.f32.mrf.mxu0  ;;  %v1018_v49 = vadd.f32 %v975_v14, %v325_v40  ;;  %v308_v55 = vpop.f32.mrf.mxu1  ;;  %vm1032_vm6 = vcmp.eq.f32.partialorder %v411_v43, 8.507059e+37 }
  0xaa   : > { %863 = vpow2.f32 %v808_v37  ;;  %v1024_v52 = vadd.f32 %v975_v14, %v298_v42  ;;  %v414_v59 = vor.u32 1.1754944e-38, %v413_v44  ;;  %vm1038_vm7 = vcmp.eq.f32.partialorder %v471_v46, 8.507059e+37 }
  0xab   : > { %v854_v45 = vpop.eup %853  ;;  %v812_v48 = vmul.f32 -1.442695, %v1010_v41  ;;  %v474_v63 = vor.u32 1.1754944e-38, %v473_v47  ;;  %v816_v0 = vmul.f32 -1.442695, %v1018_v49  ;;  %v1048_v4 = vadd.f32 %v975_v14, %v308_v55 }
  0xac   : > { %v856_v50 = vpop.eup %855  ;;  %v1021_v51 = vadd.f32 1.0, %v854_v45  ;;  %v1045_v3 = vmul.f32 -1.442695, %v1024_v52 }
  0xad   : > { %v858_v53 = vpop.eup %857  ;;  %v1029_v54 = vadd.f32 1.0, %v856_v50  ;;  %v1061_v19 = vmul.f32 -1.442695, %v1048_v4 }
  0xae   : > { %v860_v56 = vpop.eup %859  ;;  %v403_v57 = vmul.f32 %v858_v53, %v999_v34  ;;  %865 = vrcp.f32 %v1021_v51  ;;  %vm408_vm8 = vweird.f32 %v858_v53  ;;  %v531_v6 = vand.u32 2147483647, %v1021_v51 }
  0xaf   : > { %v862_v60 = vpop.eup %861  ;;  %v463_v61 = vmul.f32 %v860_v56, %v1002_v36  ;;  %867 = vpow2.f32 %v812_v48  ;;  %v533_v7 = vand.u32 2147483648, %v1021_v51  ;;  %v593_v9 = vand.u32 2147483648, %v1029_v54  ;;  %vm409_vm11 = vmor %vm407_vm4, %vm408_vm8 }
  0xb0   : > { %v864_v1 = vpop.eup %863  ;;  %v404_v2 = vsub.f32 1.0, %v403_v57  ;;  %869 = vrcp.f32 %v1029_v54  ;;  %v1053_v10 = vadd.f32 1.0, %v862_v60  ;;  %vm468_vm9 = vweird.f32 %v860_v56  ;;  %v318_v26 = vpop.f32.mrf.mxu2 }
  0xb1   : > { %v464_v5 = vsub.f32 1.0, %v463_v61  ;;  %v1055_v11 = vadd.f32 1.0, %v864_v1  ;;  %v591_v13 = vand.u32 2147483647, %v1029_v54  ;;  %871 = vpow2.f32 %v816_v0  ;;  %vm469_vm14 = vmor %vm467_vm5, %vm468_vm9 }
  0xb2   : > { %v405_v8 = vmul.f32 %v858_v53, %v404_v2  ;;  %vm527_vm10 = vweird.f32 %v1021_v51  ;;  %873 = vrcp.f32 %v1053_v10  ;;  %vm1068_vm12 = vcmp.eq.f32.partialorder %v531_v6, 8.507059e+37 }
  0xb3   : > { %v465_v12 = vmul.f32 %v860_v56, %v464_v5  ;;  %vm587_vm13 = vweird.f32 %v1029_v54  ;;  %v534_v31 = vor.u32 1.1754944e-38, %v533_v7  ;;  %v594_v32 = vor.u32 1.1754944e-38, %v593_v9 }
  0xb4   : > { %v866_v15 = vpop.eup %865  ;;  %v406_v16 = vadd.f32 %v858_v53, %v405_v8  ;;  %875 = vrcp.f32 %v1055_v11  ;;  %vm1088_vm0 = vcmp.eq.f32.partialorder %v591_v13, 8.507059e+37  ;;  %v426_v42 = vand.u32 2147483647, %v1053_v10 }
  0xb5   : > { %v868_v20 = vpop.eup %867  ;;  %v466_v21 = vadd.f32 %v860_v56, %v465_v12  ;;  %v523_v22 = vmul.f32 %v866_v15, %v1021_v51  ;;  %v1101_v43 = vadd.f32 %v975_v14, %v318_v26  ;;  %vm528_vm1 = vweird.f32 %v866_v15 }
  0xb6   : > { %v870_v29 = vpop.eup %869  ;;  %v410_v30 = vsel %vm409_vm11, %v858_v53, %v406_v16  ;;  %vm422_vm2 = vweird.f32 %v1053_v10  ;;  %v428_v53 = vand.u32 2147483648, %v1053_v10  ;;  %v1108_v55 = vadd.f32 1.0, %v868_v20  ;;  %vm529_vm4 = vmor %vm527_vm10, %vm528_vm1 }
  0xb7   : > { %v415_v34 = vsel %vm1032_vm6, %v414_v59, %v410_v30  ;;  %v470_v35 = vsel %vm469_vm14, %v860_v56, %v466_v21  ;;  %v524_v37 = vsub.f32 1.0, %v523_v22  ;;  %v583_v36 = vmul.f32 %v870_v29, %v1029_v54  ;;  %v872_v44 = vpop.eup %871 }
  0xb8   : > { %v642_v38 = vmul.f32 2.0, %v415_v34  ;;  %v475_v40 = vsel %vm1038_vm7, %v474_v63, %v470_v35  ;;  %v874_v48 = vpop.eup %873  ;;  %vm588_vm3 = vweird.f32 %v870_v29  ;;  %vm1119_vm5 = vcmp.eq.f32.partialorder %v426_v42, 8.507059e+37  ;;  %v310_v42 = vpop.f32.mrf.mxu1 }
  0xb9   : > { %v646_v45 = vmul.f32 2.0, %v475_v40  ;;  %v525_v46 = vmul.f32 %v866_v15, %v524_v37  ;;  %v584_v47 = vsub.f32 1.0, %v583_v36  ;;  %v418_v59 = vmul.f32 %v874_v48, %v1053_v10  ;;  %vm589_vm7 = vmor %vm587_vm13, %vm588_vm3  ;;  %v300_v36 = vpop.f32.mrf.mxu0 }
  0xba   : > { %v658_v50 = vsel %vm1081_vm15, %v642_v38, %v978_v17  ;;  %v876_v60 = vpop.eup %875  ;;  %vm482_vm6 = vweird.f32 %v1055_v11  ;;  %877 = vrcp.f32 %v1108_v55  ;;  %v1125_v61 = vadd.f32 1.0, %v872_v44 }
  0xbb   : > { %674 = vst [vmem:[%s1095_s30] sm:$0xff] %v658_v50  ;;  %v662_v56 = vsel %vm1081_vm15, %v646_v45, %v981_v18  ;;  %v526_v57 = vadd.f32 %v866_v15, %v525_v46  ;;  %v585_v58 = vmul.f32 %v870_v29, %v584_v47  ;;  %v419_v63 = vsub.f32 1.0, %v418_v59 }
  0xbc   : > { %678 = vst [vmem:[%s1095_s30 + $0x20] sm:$0xff] %v662_v56  ;;  %v478_v0 = vmul.f32 %v876_v60, %v1055_v11  ;;  %vm423_vm8 = vweird.f32 %v874_v48  ;;  %v486_v51 = vand.u32 2147483647, %v1055_v11  ;;  %v488_v2 = vand.u32 2147483648, %v1055_v11 }
  0xbd   : > { %v530_v18 = vsel %vm529_vm4, %v866_v15, %v526_v57  ;;  %v586_v62 = vadd.f32 %v870_v29, %v585_v58  ;;  %v420_v7 = vmul.f32 %v874_v48, %v419_v63  ;;  %vm483_vm9 = vweird.f32 %v876_v60  ;;  %vm424_vm10 = vmor %vm422_vm2, %vm423_vm8 }
  0xbe   : > { %v535_v1 = vsel %vm1068_vm12, %v534_v31, %v530_v18  ;;  %v479_v8 = vsub.f32 1.0, %v478_v0  ;;  %v546_v12 = vand.u32 2147483647, %v1108_v55  ;;  %879 = vrcp.f32 %v1125_v61  ;;  %v328_v31 = vpop.f32.mrf.mxu3  ;;  %vm484_vm13 = vmor %vm482_vm6, %vm483_vm9 }
  0xbf   : > { %v650_v5 = vmul.f32 2.0, %v535_v1  ;;  %v590_v6 = vsel %vm589_vm7, %v870_v29, %v586_v62  ;;  %v421_v15 = vadd.f32 %v874_v48, %v420_v7  ;;  %v429_v21 = vor.u32 1.1754944e-38, %v428_v53  ;;  %v320_v62 = vpop.f32.mrf.mxu2 }
  0xc0   : > { %v595_v9 = vsel %vm1088_vm0, %v594_v32, %v590_v6  ;;  %v480_v16 = vmul.f32 %v876_v60, %v479_v8  ;;  %v878_v20 = vpop.eup %877  ;;  %vm1146_vm11 = vcmp.eq.f32.partialorder %v486_v51, 8.507059e+37  ;;  %v489_v25 = vor.u32 1.1754944e-38, %v488_v2 }
  0xc1   : > { %v666_v54 = vsel %vm1081_vm15, %v650_v5, %v986_v23  ;;  %v654_v13 = vmul.f32 2.0, %v595_v9  ;;  %vm542_vm12 = vweird.f32 %v1108_v55  ;;  %v425_v26 = vsel %vm424_vm10, %v874_v48, %v421_v15 }
  0xc2   : > { %682 = vst [vmem:[%s1095_s30 + $0x40] sm:$0xff] %v666_v54  ;;  %v481_v29 = vadd.f32 %v876_v60, %v480_v16  ;;  %v538_v30 = vmul.f32 %v878_v20, %v1108_v55  ;;  %v430_v10 = vsel %vm1119_vm5, %v429_v21, %v425_v26  ;;  %vm543_vm14 = vweird.f32 %v878_v20 }
  0xc3   : > { %v670_v23 = vsel %vm1081_vm15, %v654_v13, %v989_v24  ;;  %vm1161_vm0 = vcmp.eq.f32.partialorder %v546_v12, 8.507059e+37  ;;  %v548_v24 = vand.u32 2147483648, %v1108_v55  ;;  %v643_v34 = vmul.f32 2.0, %v430_v10  ;;  %vm544_vm1 = vmor %vm542_vm12, %vm543_vm14 }
  0xc4   : > { %686 = vst [vmem:[%s1095_s30 + $0x60] sm:$0xff] %v670_v23  ;;  %v485_v35 = vsel %vm484_vm13, %v876_v60, %v481_v29  ;;  %v539_v37 = vsub.f32 1.0, %v538_v30  ;;  %881 = vpow2.f32 %v1045_v3  ;;  %v880_v39 = vpop.eup %879  ;;  %v813_v11 = vmul.f32 -1.442695, %v1101_v43 }
  0xc5   : > { %v490_v38 = vsel %vm1146_vm11, %v489_v25, %v485_v35  ;;  %883 = vpow2.f32 %v1061_v19  ;;  %v1172_v40 = vadd.f32 %v975_v14, %v328_v31  ;;  %v659_v44 = vsel %vm1081_vm15, %v643_v34, %v992_v27 }
  0xc6   : > { %v647_v45 = vmul.f32 2.0, %v490_v38  ;;  %v540_v3 = vmul.f32 %v878_v20, %v539_v37  ;;  %v598_v46 = vmul.f32 %v880_v39, %v1125_v61  ;;  %675 = vst [vmem:[%s1095_s30 + $0x8] sm:$0xff] %v659_v44  ;;  %v549_v47 = vor.u32 1.1754944e-38, %v548_v24  ;;  %v330_v5 = vpop.f32.mrf.mxu3 }
  0xc7   : > { %885 = vpow2.f32 %v813_v11  ;;  %v817_v19 = vmul.f32 -1.442695, %v1172_v40  ;;  %v1181_v48 = vadd.f32 %v975_v14, %v300_v36  ;;  %v1187_v27 = vadd.f32 %v975_v14, %v310_v42 }
  0xc8   : > { %v663_v50 = vsel %vm1081_vm15, %v647_v45, %v995_v28  ;;  %v541_v53 = vadd.f32 %v878_v20, %v540_v3  ;;  %v599_v56 = vsub.f32 1.0, %v598_v46  ;;  %v606_v57 = vand.u32 2147483647, %v1125_v61 }
  0xc9   : > { %679 = vst [vmem:[%s1095_s30 + $0x28] sm:$0xff] %v663_v50  ;;  %v608_v58 = vand.u32 2147483648, %v1125_v61  ;;  %887 = vpow2.f32 %v817_v19  ;;  %v806_v59 = vmul.f32 -1.442695, %v1181_v48  ;;  %vm603_vm2 = vweird.f32 %v880_v39 }
  0xca   : > { %v882_v60 = vpop.eup %881  ;;  %v545_v17 = vsel %vm544_vm1, %v878_v20, %v541_v53  ;;  %v600_v28 = vmul.f32 %v880_v39, %v599_v56  ;;  %v810_v18 = vmul.f32 -1.442695, %v1187_v27  ;;  %vm602_vm3 = vweird.f32 %v1125_v61 }
  0xcb   : > { %v884_v63 = vpop.eup %883  ;;  %v550_v0 = vsel %vm1161_vm0, %v549_v47, %v545_v17  ;;  %v1200_v55 = vadd.f32 1.0, %v882_v60  ;;  %889 = vpow2.f32 %v806_v59  ;;  %vm604_vm4 = vmor %vm602_vm3, %vm603_vm2  ;;  %v609_v7 = vor.u32 1.1754944e-38, %v608_v58 }
  0xcc   : > { %v651_v1 = vmul.f32 2.0, %v550_v0  ;;  %v601_v51 = vadd.f32 %v880_v39, %v600_v28  ;;  %v1202_v2 = vadd.f32 1.0, %v884_v63  ;;  %891 = vpow2.f32 %v810_v18 }
  0xcd   : > { %v886_v6 = vpop.eup %885  ;;  %893 = vrcp.f32 %v1200_v55  ;;  %v1206_v8 = vadd.f32 %v975_v14, %v320_v62  ;;  %vm607_vm5 = vcmp.eq.f32.partialorder %v606_v57, 8.507059e+37  ;;  %v441_v13 = vand.u32 2147483647, %v1200_v55 }
  0xce   : > { %v667_v61 = vsel %vm1081_vm15, %v651_v1, %v1010_v41  ;;  %v605_v9 = vsel %vm604_vm4, %v880_v39, %v601_v51  ;;  %895 = vrcp.f32 %v1202_v2  ;;  %v1215_v15 = vadd.f32 %v975_v14, %v330_v5 }
  0xcf   : > { %v888_v12 = vpop.eup %887  ;;  %683 = vst [vmem:[%s1095_s30 + $0x48] sm:$0xff] %v667_v61  ;;  %v610_v54 = vsel %vm607_vm5, %v609_v7, %v605_v9  ;;  %v443_v20 = vand.u32 2147483648, %v1200_v55  ;;  %v1218_v21 = vadd.f32 1.0, %v886_v6  ;;  %v501_v25 = vand.u32 2147483647, %v1202_v2 }
  0xd0   : > { %v655_v16 = vmul.f32 2.0, %v610_v54  ;;  %v1220_v22 = vadd.f32 1.0, %v888_v12  ;;  %v503_v23 = vand.u32 2147483648, %v1202_v2  ;;  %v814_v26 = vmul.f32 -1.442695, %v1206_v8 }
  0xd1   : > { %v890_v41 = vpop.eup %889  ;;  %897 = vrcp.f32 %v1218_v21  ;;  %vm437_vm6 = vweird.f32 %v1200_v55  ;;  %v818_v31 = vmul.f32 -1.442695, %v1215_v15  ;;  %vm1234_vm7 = vcmp.eq.f32.partialorder %v441_v13, 8.507059e+37 }
  0xd2   : > { %v892_v29 = vpop.eup %891  ;;  %v671_v14 = vsel %vm1081_vm15, %v655_v16, %v1018_v49  ;;  %899 = vrcp.f32 %v1220_v22  ;;  %v444_v34 = vor.u32 1.1754944e-38, %v443_v20  ;;  %vm497_vm8 = vweird.f32 %v1202_v2 }
  0xd3   : > { %v894_v30 = vpop.eup %893  ;;  %687 = vst [vmem:[%s1095_s30 + $0x68] sm:$0xff] %v671_v14  ;;  %vm1240_vm9 = vcmp.eq.f32.partialorder %v501_v25, 8.507059e+37  ;;  %v504_v37 = vor.u32 1.1754944e-38, %v503_v23  ;;  %901 = vpow2.f32 %v814_v26  ;;  %v561_v39 = vand.u32 2147483647, %v1218_v21 }
  0xd4   : > { %v896_v10 = vpop.eup %895  ;;  %v433_v32 = vmul.f32 %v894_v30, %v1200_v55  ;;  %v563_v38 = vand.u32 2147483648, %v1218_v21  ;;  %v1246_v11 = vadd.f32 1.0, %v890_v41  ;;  %vm438_vm10 = vweird.f32 %v894_v30 }
  0xd5   : > { %v493_v49 = vmul.f32 %v896_v10, %v1202_v2  ;;  %v1248_v44 = vadd.f32 1.0, %v892_v29  ;;  %903 = vpow2.f32 %v818_v31  ;;  %v621_v46 = vand.u32 2147483647, %v1220_v22  ;;  %vm439_vm0 = vmor %vm437_vm6, %vm438_vm10 }
  0xd6   : > { %v434_v36 = vsub.f32 1.0, %v433_v32  ;;  %v623_v47 = vand.u32 2147483648, %v1220_v22  ;;  %905 = vrcp.f32 %v1246_v11  ;;  %vm498_vm11 = vweird.f32 %v896_v10 }
  0xd7   : > { %v494_v42 = vsub.f32 1.0, %v493_v49  ;;  %v898_v45 = vpop.eup %897  ;;  %vm557_vm12 = vweird.f32 %v1218_v21  ;;  %vm1255_vm13 = vcmp.eq.f32.partialorder %v561_v39, 8.507059e+37  ;;  %vm617_vm14 = vweird.f32 %v1220_v22  ;;  %vm499_vm1 = vmor %vm497_vm8, %vm498_vm11 }
  0xd8   : > { %v435_v3 = vmul.f32 %v894_v30, %v434_v36  ;;  %v900_v19 = vpop.eup %899  ;;  %v553_v53 = vmul.f32 %v898_v45, %v1218_v21  ;;  %v564_v28 = vor.u32 1.1754944e-38, %v563_v38  ;;  %907 = vrcp.f32 %v1248_v44 }
  0xd9   : > { %v495_v50 = vmul.f32 %v896_v10, %v494_v42  ;;  %v613_v58 = vmul.f32 %v900_v19, %v1220_v22  ;;  %v902_v59 = vpop.eup %901  ;;  %vm1267_vm2 = vcmp.eq.f32.partialorder %v621_v46, 8.507059e+37  ;;  %v624_v0 = vor.u32 1.1754944e-38, %v623_v47 }
  0xda   : > { %v436_v56 = vadd.f32 %v894_v30, %v435_v3  ;;  %v554_v17 = vsub.f32 1.0, %v553_v53  ;;  %vm558_vm3 = vweird.f32 %v898_v45  ;;  %vm618_vm4 = vweird.f32 %v900_v19 }
  0xdb   : > { %v496_v60 = vadd.f32 %v896_v10, %v495_v50  ;;  %v614_v62 = vsub.f32 1.0, %v613_v58  ;;  %v904_v1 = vpop.eup %903  ;;  %v456_v13 = vand.u32 2147483647, %v1246_v11  ;;  %vm559_vm5 = vmor %vm557_vm12, %vm558_vm3  ;;  %v458_v41 = vand.u32 2147483648, %v1246_v11 }
  0xdc   : > { %v440_v18 = vsel %vm439_vm0, %v894_v30, %v436_v56  ;;  %v555_v5 = vmul.f32 %v898_v45, %v554_v17  ;;  %v906_v6 = vpop.eup %905  ;;  %v1283_v25 = vadd.f32 1.0, %v902_v59  ;;  %vm619_vm6 = vmor %vm617_vm14, %vm618_vm4  ;;  %vm452_vm8 = vweird.f32 %v1246_v11 }
  0xdd   : > { %v445_v55 = vsel %vm1234_vm7, %v444_v34, %v440_v18  ;;  %v500_v51 = vsel %vm499_vm1, %v896_v10, %v496_v60  ;;  %v615_v61 = vmul.f32 %v900_v19, %v614_v62  ;;  %v448_v54 = vmul.f32 %v906_v6, %v1246_v11 }
  0xde   : > { %v644_v7 = vmul.f32 2.0, %v445_v55  ;;  %v505_v2 = vsel %vm1240_vm9, %v504_v37, %v500_v51  ;;  %v556_v12 = vadd.f32 %v898_v45, %v555_v5  ;;  %v908_v23 = vpop.eup %907  ;;  %vm453_vm7 = vweird.f32 %v906_v6 }
  0xdf   : > { %v648_v9 = vmul.f32 2.0, %v505_v2  ;;  %v616_v20 = vadd.f32 %v900_v19, %v615_v61  ;;  %v449_v14 = vsub.f32 1.0, %v448_v54  ;;  %v508_v31 = vmul.f32 %v908_v23, %v1248_v44  ;;  %vm454_vm9 = vmor %vm452_vm8, %vm453_vm7 }
  0xe0   : > { %v660_v16 = vsel %vm1081_vm15, %v644_v7, %v1024_v52  ;;  %v560_v29 = vsel %vm559_vm5, %v898_v45, %v556_v12  ;;  %v1291_v52 = vadd.f32 1.0, %v904_v1  ;;  %909 = vrcp.f32 %v1283_v25 }
  0xe1   : > { %676 = vst [vmem:[%s1095_s30 + $0x10] sm:$0xff] %v660_v16  ;;  %v664_v26 = vsel %vm1081_vm15, %v648_v9, %v1048_v4  ;;  %v565_v21 = vsel %vm1255_vm13, %v564_v28, %v560_v29  ;;  %v620_v30 = vsel %vm619_vm6, %v900_v19, %v616_v20  ;;  %v450_v32 = vmul.f32 %v906_v6, %v449_v14 }
  0xe2   : > { %680 = vst [vmem:[%s1095_s30 + $0x30] sm:$0xff] %v664_v26  ;;  %v652_v10 = vmul.f32 2.0, %v565_v21  ;;  %v625_v4 = vsel %vm1267_vm2, %v624_v0, %v620_v30  ;;  %v459_v24 = vor.u32 1.1754944e-38, %v458_v41  ;;  %v509_v34 = vsub.f32 1.0, %v508_v31 }
  0xe3   : > { %v656_v22 = vmul.f32 2.0, %v625_v4  ;;  %v451_v35 = vadd.f32 %v906_v6, %v450_v32  ;;  %v518_v37 = vand.u32 2147483648, %v1248_v44  ;;  %911 = vrcp.f32 %v1291_v52 }
  0xe4   : > { %v668_v49 = vsel %vm1081_vm15, %v652_v10, %v1101_v43  ;;  %v510_v39 = vmul.f32 %v908_v23, %v509_v34  ;;  %vm513_vm10 = vweird.f32 %v908_v23  ;;  %v516_v38 = vand.u32 2147483647, %v1248_v44 }
  0xe5   : > { %684 = vst [vmem:[%s1095_s30 + $0x50] sm:$0xff] %v668_v49  ;;  %v672_v36 = vsel %vm1081_vm15, %v656_v22, %v1172_v40  ;;  %v455_v11 = vsel %vm454_vm9, %v906_v6, %v451_v35  ;;  %vm457_vm11 = vcmp.eq.f32.partialorder %v456_v13, 8.507059e+37  ;;  %vm512_vm12 = vweird.f32 %v1248_v44 }
  0xe6   : > { %688 = vst [vmem:[%s1095_s30 + $0x70] sm:$0xff] %v672_v36  ;;  %v460_v43 = vsel %vm457_vm11, %v459_v24, %v455_v11  ;;  %v511_v42 = vadd.f32 %v908_v23, %v510_v39  ;;  %v910_v45 = vpop.eup %909  ;;  %vm514_vm13 = vmor %vm512_vm12, %vm513_vm10  ;;  %v519_v46 = vor.u32 1.1754944e-38, %v518_v37  ;;  %vm517_vm14 = vcmp.eq.f32.partialorder %v516_v38, 8.507059e+37 }
  0xe7   : > { %v645_v3 = vmul.f32 2.0, %v460_v43  ;;  %v568_v40 = vmul.f32 %v910_v45, %v1283_v25  ;;  %v576_v58 = vand.u32 2147483647, %v1283_v25  ;;  %v578_v59 = vand.u32 2147483648, %v1283_v25 }
  0xe8   : > { %v515_v47 = vsel %vm514_vm13, %v908_v23, %v511_v42  ;;  %vm573_vm0 = vweird.f32 %v910_v45  ;;  %vm572_vm1 = vweird.f32 %v1283_v25  ;;  %v636_v63 = vand.u32 2147483647, %v1291_v52 }
  0xe9   : > { %v912_v19 = vpop.eup %911  ;;  %v661_v50 = vsel %vm1081_vm15, %v645_v3, %v1181_v48  ;;  %v520_v53 = vsel %vm517_vm14, %v519_v46, %v515_v47  ;;  %v569_v57 = vsub.f32 1.0, %v568_v40  ;;  %v638_v48 = vand.u32 2147483648, %v1291_v52  ;;  %vm574_vm3 = vmor %vm572_vm1, %vm573_vm0 }
  0xea   : > { %677 = vst [vmem:[%s1095_s30 + $0x18] sm:$0xff] %v661_v50  ;;  %v649_v56 = vmul.f32 2.0, %v520_v53  ;;  %v628_v44 = vmul.f32 %v912_v19, %v1291_v52  ;;  %vm633_vm2 = vweird.f32 %v912_v19  ;;  %v579_v0 = vor.u32 1.1754944e-38, %v578_v59 }
  0xeb   : > { %v570_v17 = vmul.f32 %v910_v45, %v569_v57  ;;  %vm577_vm4 = vcmp.eq.f32.partialorder %v576_v58, 8.507059e+37  ;;  %vm632_vm5 = vweird.f32 %v1291_v52  ;;  %v639_v51 = vor.u32 1.1754944e-38, %v638_v48 }
  0xec   : > { %v665_v60 = vsel %vm1081_vm15, %v649_v56, %v1187_v27  ;;  %v629_v28 = vsub.f32 1.0, %v628_v44  ;;  %vm634_vm6 = vmor %vm632_vm5, %vm633_vm2  ;;  %vm637_vm7 = vcmp.eq.f32.partialorder %v636_v63, 8.507059e+37 }
  0xed   : > { %681 = vst [vmem:[%s1095_s30 + $0x38] sm:$0xff] %v665_v60  ;;  %v571_v18 = vadd.f32 %v910_v45, %v570_v17 }
  0xee   : > { %v630_v62 = vmul.f32 %v912_v19, %v629_v28 }
  0xef   : > { %v575_v1 = vsel %vm574_vm3, %v910_v45, %v571_v18 }
  0xf0   : > { %v631_v27 = vadd.f32 %v912_v19, %v630_v62  ;;  %v580_v55 = vsel %vm577_vm4, %v579_v0, %v575_v1 }
  0xf1   : > { %v653_v5 = vmul.f32 2.0, %v580_v55 }
  0xf2   : > { %v635_v6 = vsel %vm634_vm6, %v912_v19, %v631_v27 }
  0xf3   : > { %v640_v7 = vsel %vm637_vm7, %v639_v51, %v635_v6  ;;  %v669_v2 = vsel %vm1081_vm15, %v653_v5, %v1206_v8 }
  0xf4   : > { %v657_v61 = vmul.f32 2.0, %v640_v7  ;;  %685 = vst [vmem:[%s1095_s30 + $0x58] sm:$0xff] %v669_v2 }
  0xf6   : > { %v673_v9 = vsel %vm1081_vm15, %v657_v61, %v1215_v15 }
  0xf7   : > { %689 = vst [vmem:[%s1095_s30 + $0x78] sm:$0xff] %v673_v9 }
  0xf8 PF: > { %s13_s12 = sadd.s32 1, %s919_s12  }
  0xf9   : > { %p10_p4 = scmp.ge.s32.totalorder %s13_s12, 6  }
  0xfb   :  { %12 = sbr.rel (!%p10_p4) target bundleno = 1 (0x1), region = 62 }

// kernel: deformable_conv2d_forward.3
= control target key start
LH: loop header
LB: loop body
LE: loop exit
PB: predicated region body
PF: predicated region fallthrough
CT: control target
= control target key end

     0   :  { %s546_s9 = smov 0   ;;  %s587_s0 = inlined_call_operand.vmem [shape: bf16[512,36], index: 0, kind: input, shape index: {}]   ;;  %s588_s1 = inlined_call_operand.vmem [shape: bf16[36,128], index: 1, kind: input, shape index: {}]   ;;  %s589_s2 = inlined_call_operand.vmem [shape: bf16[512,128], index: 2, kind: output, shape index: {}]  }
   0x1 LB: > { %s390_s10 = sadd.s32 4294967295, %s529_s9   ;;  %p394_p0 = scmp.ge.s32.totalorder %s529_s9, 1  ;;  %s529_s9 = sphi %s546_s9, %s12_s9  }
   0x2   : > { %p113_p1 = scmp.lt.s32.totalorder %s529_s9, 5 }
   0x4   : > { %p114_p2 = pnand %p394_p0, %p113_p1 }
   0x5   : > { %s395_s13 = sshll.u32 (!%p114_p2), %s390_s10, 4 }
   0x6   : > { %117 = sbr.rel (%p114_p2) target bundleno = 189 (0xbd), region = 28  ;;  %p136_p3 = scmp.lt.s32.totalorder (!%p114_p2), %s395_s13, 63 }
   0xb   : > { %v168_v0 = vld [vmem:[%s588_s1 + $0x10] sm:$0x3]  ;;  %vm249_vm0 = vcmask 1041408   ;;  %s591_s13 = smov (!%p136_p3, %s395_s13), 63  ;;  %v458_v4 = vld [vmem:[%s588_s1 + $0x8] sm:$0xff]  ;;  %v457_v5 = vld [vmem:[%s588_s1] sm:$0xff] }
   0xc   : > { %v218_v1 = vunpack.c.l.b16 %v168_v0  ;;  %s396_s16 = sshll.u32 %s591_s13, 2  ;;  %vm224_vm1 = vcmask 293888  }
   0xd   : > { %s139_s21 = scalar_lea.vmem %s587_s0, %s396_s16  ;;  %s145_s24 = scalar_lea.vmem %s589_s2, %s396_s16 }
   0xe   : > { %v221_v2 = vpack.c.b16 %v218_v1, %v218_v1  ;;  %v449_v6 = vld [vmem:[%s139_s21] sm:$0xff]  ;;  %v451_v7 = vld [vmem:[%s139_s21 + $0x10] sm:$0xff]  ;;  %v450_v10 = vld [vmem:[%s139_s21 + $0x8] sm:$0xff] }
   0xf   : > { %v453_v8 = vld [vmem:[%s139_s21 + $0x20] sm:$0xff]  ;;  %v455_v9 = vld [vmem:[%s139_s21 + $0x30] sm:$0xff]  ;;  %v452_v11 = vld [vmem:[%s139_s21 + $0x18] sm:$0xff] }
  0x10   : > { %v251_v3 = vsel %vm249_vm0, %v221_v2, 0  ;;  %v454_v12 = vld [vmem:[%s139_s21 + $0x28] sm:$0xff]  ;;  %v456_v13 = vld [vmem:[%s139_s21 + $0x38] sm:$0xff] }
  0x11   : > { %258 = vmatpush.bf16.msra.mxu0 %v251_v3  ;;  %506 = vmatpush.bf16.msra.mxu1 %v251_v3 }
  0x12   : > { %507 = vmatpush.bf16.msra.mxu2 %v251_v3  ;;  %508 = vmatpush.bf16.msra.mxu3 %v251_v3 }
  0x15   : > { %259 = vmatpush.bf16.msra.mxu0 %v458_v4  ;;  %509 = vmatpush.bf16.msra.mxu1 %v458_v4 }
  0x16   : > { %510 = vmatpush.bf16.msra.mxu2 %v458_v4  ;;  %511 = vmatpush.bf16.msra.mxu3 %v458_v4 }
  0x19   : > { %260 = vmatpush.bf16.msra.mxu0 %v457_v5  ;;  %512 = vmatpush.bf16.msra.mxu1 %v457_v5 }
  0x1a   : > { %513 = vmatpush.bf16.msra.mxu2 %v457_v5  ;;  %514 = vmatpush.bf16.msra.mxu3 %v457_v5 }
  0x1c   : > { %439 = vmatmul.msk.bf16.vlgmr.msra.gmra.mxu0 %vm224_vm1, %v449_v6  ;;  %441 = vmatmul.msk.bf16.vlgmr.msra.gmra.mxu1 %vm224_vm1, %v451_v7 }
  0x1d   : > { %443 = vmatmul.msk.bf16.vlgmr.msra.gmra.mxu2 %vm224_vm1, %v453_v8  ;;  %445 = vmatmul.msk.bf16.vlgmr.msra.gmra.mxu3 %vm224_vm1, %v455_v9 }
  0x2c   : > { %440 = vmatmul.msk.bf16.gmra.mxu0 %vm224_vm1, %v450_v10  ;;  %442 = vmatmul.msk.bf16.gmra.mxu1 %vm224_vm1, %v452_v11 }
  0x2d   : > { %444 = vmatmul.msk.bf16.gmra.mxu2 %vm224_vm1, %v454_v12  ;;  %446 = vmatmul.msk.bf16.gmra.mxu3 %vm224_vm1, %v456_v13 }
  0x99   : > { %v262_v14 = vpop.f32.mrf.mxu0  ;;  %v272_v15 = vpop.f32.mrf.mxu1 }
  0xa0   : > { %v282_v16 = vpop.f32.mrf.mxu2  ;;  %v292_v17 = vpop.f32.mrf.mxu3 }
  0xa1   : > { %v264_v18 = vpop.f32.mrf.mxu0  ;;  %v274_v19 = vpop.f32.mrf.mxu1 }
  0xa2   : > { %v462_v20 = vpack.c.bf16 %v264_v18, %v262_v14  ;;  %v472_v21 = vpack.c.bf16 %v274_v19, %v272_v15 }
  0xa4   : > { %463 = vst [vmem:[%s145_s24] sm:$0xff] %v462_v20  }
  0xa5   : > { %500 = vst [vmem:[%s145_s24 + $0x10] sm:$0xff] %v472_v21  }
  0xa8   : > { %v284_v22 = vpop.f32.mrf.mxu2  ;;  %v294_v23 = vpop.f32.mrf.mxu3 }
  0xa9   : > { %v482_v24 = vpack.c.bf16 %v284_v22, %v282_v16  ;;  %v492_v25 = vpack.c.bf16 %v294_v23, %v292_v17  ;;  %v267_v26 = vpop.f32.mrf.mxu0  ;;  %v277_v27 = vpop.f32.mrf.mxu1 }
  0xab   : > { %502 = vst [vmem:[%s145_s24 + $0x20] sm:$0xff] %v482_v24  }
  0xac   : > { %504 = vst [vmem:[%s145_s24 + $0x30] sm:$0xff] %v492_v25  }
  0xb0   : > { %v287_v28 = vpop.f32.mrf.mxu2  ;;  %v297_v29 = vpop.f32.mrf.mxu3 }
  0xb1   : > { %v269_v30 = vpop.f32.mrf.mxu0  ;;  %v279_v31 = vpop.f32.mrf.mxu1 }
  0xb2   : > { %v467_v32 = vpack.c.bf16 %v269_v30, %v267_v26  ;;  %v477_v33 = vpack.c.bf16 %v279_v31, %v277_v27 }
  0xb4   : > { %499 = vst [vmem:[%s145_s24 + $0x8] sm:$0xff] %v467_v32  }
  0xb5   : > { %501 = vst [vmem:[%s145_s24 + $0x18] sm:$0xff] %v477_v33  }
  0xb8   : > { %v289_v34 = vpop.f32.mrf.mxu2  ;;  %v299_v35 = vpop.f32.mrf.mxu3 }
  0xb9   : > { %v487_v36 = vpack.c.bf16 %v289_v34, %v287_v28  ;;  %v497_v37 = vpack.c.bf16 %v299_v35, %v297_v29 }
  0xbb   : > { %503 = vst [vmem:[%s145_s24 + $0x28] sm:$0xff] %v487_v36  }
  0xbc   : > { %505 = vst [vmem:[%s145_s24 + $0x38] sm:$0xff] %v497_v37  }
  0xbd PF: > { %s12_s9 = sadd.s32 1, %s529_s9  }
  0xbe   : > { %p9_p4 = scmp.ge.s32.totalorder %s12_s9, 6  }
  0xc0   :  { %11 = sbr.rel (!%p9_p4) target bundleno = 1 (0x1), region = 58 }

</bundles_post_ra>
